<compile_context>
chip_gen: v6e
topology: v6e:2x2x1
jax: 0.10.0
libtpu: 0.0.40
codegen_flags: <defaults>
</compile_context>

<pallas_src>
import functools

import jax
import jax.numpy as jnp
from jax.experimental import pallas as pl
from jax.experimental.pallas import tpu as pltpu


def guided_filter_kernel(x_ref, y_ref, invn_ref, bhd_ref, bwd_ref, o_ref, *, eps):
    """One (H, L) slab (L = BC*W channels packed on the lane axis) per step."""
    H = x_ref.shape[1]

    x = x_ref[0].astype(jnp.float32)        # (H, L)
    y = y_ref[0].astype(jnp.float32)        # (H, L)
    inv_n = invn_ref[...]                   # (H, L)  precomputed 1 / box(ones)
    bhd4 = bhd_ref[...]                     # (4H, 4H) block-diag banded rows matrix
    bwd = bwd_ref[...]                      # (L, L)   block-diag banded cols matrix

    # ---- round 1: box over [x, y, x*y, x*x], fused into 2 matmuls ----------
    s1 = jnp.concatenate([x, y, x * y, x * x], axis=0)            # (4H, L)
    t1 = jnp.dot(bhd4, s1, preferred_element_type=jnp.float32)    # rows (H) pass
    b1 = jnp.dot(t1, bwd, preferred_element_type=jnp.float32)     # cols (W) pass

    mean_x = b1[0 * H:1 * H] * inv_n
    mean_y = b1[1 * H:2 * H] * inv_n
    mean_xy = b1[2 * H:3 * H] * inv_n
    mean_xx = b1[3 * H:4 * H] * inv_n

    cov_xy = mean_xy - mean_x * mean_y
    var_x = mean_xx - mean_x * mean_x

    # approx=True (EUP) was evaluated per the review; kept exact here so the
    # strict 1e-4 reference check holds.  Flip to approx=True if ~1e-3 output
    # error is acceptable (it moves the divide off the VPU).
    A = cov_xy * pl.reciprocal(var_x + eps, approx=False)
    b = mean_y - A * mean_x

    # ---- round 2: box over [A, b], reusing a prefix of the same matrices ---
    s2 = jnp.concatenate([A, b], axis=0)                          # (2H, L)
    t2 = jnp.dot(bhd_ref[:2 * H, :2 * H], s2,
                 preferred_element_type=jnp.float32)
    b2 = jnp.dot(t2, bwd, preferred_element_type=jnp.float32)

    mean_A = b2[0 * H:1 * H] * inv_n
    mean_b = b2[1 * H:2 * H] * inv_n

    o_ref[0] = (mean_A * x + mean_b).astype(o_ref.dtype)


def _pick_channels_per_block(nc, w, lane_target=128):
    """Smallest divisor of nc whose packed lane width reaches lane_target."""
    for d in range(1, nc + 1):
        if nc % d == 0 and d * w >= lane_target:
            return d
    return nc


def guided_filter(x, y, r=1, eps=0.01):
    """Pallas guided filter.  x, y: (N, C, H, W) float32."""
    N, C, H, W = x.shape
    assert y.shape == x.shape
    NC = N * C

    BC = _pick_channels_per_block(NC, W)      # channels per grid step
    G = NC // BC                              # grid length
    L = BC * W                                # packed lane width (>=128 if possible)

    # ---- constants (unnormalized 0/1 band matrices; the 1/(2r+1)^2 weight
    # cancels exactly against 1/N so it is dropped everywhere) ---------------
    ih = jnp.arange(H)
    bh = (jnp.abs(ih[:, None] - ih[None, :]) <= r).astype(jnp.float32)   # (H, H)
    bhd = jnp.kron(jnp.eye(4, dtype=jnp.float32), bh)                    # (4H, 4H)

    iw = jnp.arange(W)
    bw1 = (jnp.abs(iw[:, None] - iw[None, :]) <= r).astype(jnp.float32)  # (W, W)
    bwd = jnp.kron(jnp.eye(BC, dtype=jnp.float32), bw1)                  # (L, L)

    # Border normalization map (box filter of ones) hoisted out of the kernel.
    cnt_h = (jnp.minimum(ih + r, H - 1) - jnp.maximum(ih - r, 0) + 1).astype(jnp.float32)
    cnt_w = (jnp.minimum(iw + r, W - 1) - jnp.maximum(iw - r, 0) + 1).astype(jnp.float32)
    inv_n = 1.0 / (cnt_h[:, None] * cnt_w[None, :])                      # (H, W)
    inv_n = jnp.tile(inv_n, (1, BC))                                     # (H, L)

    # ---- pack BC channels onto the lane axis: (G, H, BC*W) -----------------
    def pack(a):
        return a.reshape(G, BC, H, W).transpose(0, 2, 1, 3).reshape(G, H, L)

    xp, yp = pack(x), pack(y)

    kern = functools.partial(guided_filter_kernel, eps=eps)

    # Explicit VMEM budget: double-buffered I/O + constants + live f32
    # intermediates, clamped to be safe on v7x (64 MiB physical VMEM).
    blk_bytes = H * L * 4
    const_bytes = 4 * (L * L + (4 * H) * (4 * H) + H * L)
    est = 6 * blk_bytes + 2 * const_bytes + 20 * blk_bytes
    vmem_limit = int(min(64 * 2 ** 20, max(32 * 2 ** 20, 2 * est)))

    out = pl.pallas_call(
        kern,
        out_shape=jax.ShapeDtypeStruct((G, H, L), x.dtype),
        grid_spec=pltpu.PrefetchScalarGridSpec(
            num_scalar_prefetch=0,
            grid=(G,),
            in_specs=[
                pl.BlockSpec((1, H, L), lambda i: (i, 0, 0)),     # x slab
                pl.BlockSpec((1, H, L), lambda i: (i, 0, 0)),     # y slab
                pl.BlockSpec((H, L), lambda i: (0, 0)),           # inv_N (constant)
                pl.BlockSpec((4 * H, 4 * H), lambda i: (0, 0)),   # BhD (constant)
                pl.BlockSpec((L, L), lambda i: (0, 0)),           # BwD (constant)
            ],
            out_specs=pl.BlockSpec((1, H, L), lambda i: (i, 0, 0)),
        ),
        compiler_params=pltpu.CompilerParams(
            dimension_semantics=("parallel",),
            vmem_limit_bytes=vmem_limit),
    )(xp, yp, inv_n, bhd, bwd)

    # unpack lanes back to (N, C, H, W)
    return out.reshape(G, H, BC, W).transpose(0, 2, 1, 3).reshape(N, C, H, W)


def _ref_guided_filter(x, y, r=1, eps=0.01):
    """Pure-JAX reference matching the PyTorch module exactly."""
    N, C, H, W = x.shape
    k = 2 * r + 1
    wgt = 1.0 / (k * k)

    def box(a, ch):
        kern = jnp.full((ch, 1, k, k), wgt, jnp.float32)
        return jax.lax.conv_general_dilated(
            a, kern, window_strides=(1, 1), padding="SAME",
            feature_group_count=ch,
            dimension_numbers=("NCHW", "OIHW", "NCHW"))

    Nn = box(jnp.ones((1, 1, H, W), x.dtype), 1)
    mean_x = box(x, C) / Nn
    mean_y = box(y, C) / Nn
    cov_xy = box(x * y, C) / Nn - mean_x * mean_y
    var_x = box(x * x, C) / Nn - mean_x * mean_x
    A = cov_xy / (var_x + eps)
    b = mean_y - A * mean_x
    mean_A = box(A, C) / Nn
    mean_b = box(b, C) / Nn
    return mean_A * x + mean_b


if __name__ == "__main__":
    key = jax.random.PRNGKey(0)
    k1, k2 = jax.random.split(key)
    # N*C = 16 channel slabs, W = 16 -> BC = 8 channels packed per step
    # (128 lanes, lane-dense stores) and a grid of 2 parallel steps.
    N, C, H, W = 2, 8, 16, 16
    x = jax.random.normal(k1, (N, C, H, W), dtype=jnp.float32)
    y = jax.random.normal(k2, (N, C, H, W), dtype=jnp.float32)

    out = guided_filter(x, y, r=1, eps=0.01)
    out = jax.block_until_ready(out)

    ref = _ref_guided_filter(x, y, r=1, eps=0.01)
    assert out.shape == (N, C, H, W)
    assert jnp.allclose(out, ref, atol=1e-4, rtol=1e-4)

    print("KERNEL_OK")
</pallas_src>

<mosaic_0001>
module attributes {stable_mosaic.version = 11 : i64} {
  func.func @guided_filter_kernel(%arg0: i32, %arg1: memref<1x16x128xf32, #tpu.memory_space<vmem>>, %arg2: memref<1x16x128xf32, #tpu.memory_space<vmem>>, %arg3: memref<16x128xf32, #tpu.memory_space<vmem>>, %arg4: memref<64x64xf32, #tpu.memory_space<vmem>>, %arg5: memref<128x128xf32, #tpu.memory_space<vmem>>, %arg6: memref<1x16x128xf32, #tpu.memory_space<vmem>>) attributes {dimension_semantics = [#tpu.dimension_semantics<parallel>], iteration_bounds = array<i64: 2>, scalar_prefetch = 0 : i64, scratch_operands = 0 : i64, tpu.core_type = #tpu.core_type<tc>, window_params = [{transform_indices = @transform_0, window_bounds = array<i64: 1, 16, 128>}, {transform_indices = @transform_1, window_bounds = array<i64: 1, 16, 128>}, {pipeline_mode = #tpu.pipeline_mode<synchronous>, transform_indices = @transform_2, window_bounds = array<i64: 16, 128>}, {pipeline_mode = #tpu.pipeline_mode<synchronous>, transform_indices = @transform_3, window_bounds = array<i64: 64, 64>}, {pipeline_mode = #tpu.pipeline_mode<synchronous>, transform_indices = @transform_4, window_bounds = array<i64: 128, 128>}, {transform_indices = @transform_5, window_bounds = array<i64: 1, 16, 128>}]} {
    %c0 = arith.constant 0 : index
    %c0_0 = arith.constant 0 : index
    %c0_1 = arith.constant 0 : index
    %0 = vector.load %arg1[%c0, %c0_0, %c0_1] : memref<1x16x128xf32, #tpu.memory_space<vmem>>, vector<1x16x128xf32>
    %1 = vector.shape_cast %0 : vector<1x16x128xf32> to vector<16x128xf32>
    %c0_2 = arith.constant 0 : index
    %c0_3 = arith.constant 0 : index
    %c0_4 = arith.constant 0 : index
    %2 = vector.load %arg2[%c0_2, %c0_3, %c0_4] : memref<1x16x128xf32, #tpu.memory_space<vmem>>, vector<1x16x128xf32>
    %3 = vector.shape_cast %2 : vector<1x16x128xf32> to vector<16x128xf32>
    %c0_5 = arith.constant 0 : index
    %c0_6 = arith.constant 0 : index
    %4 = vector.load %arg3[%c0_5, %c0_6] : memref<16x128xf32, #tpu.memory_space<vmem>>, vector<16x128xf32>
    %c0_7 = arith.constant 0 : index
    %c0_8 = arith.constant 0 : index
    %5 = vector.load %arg4[%c0_7, %c0_8] : memref<64x64xf32, #tpu.memory_space<vmem>>, vector<64x64xf32>
    %c0_9 = arith.constant 0 : index
    %c0_10 = arith.constant 0 : index
    %6 = vector.load %arg5[%c0_9, %c0_10] : memref<128x128xf32, #tpu.memory_space<vmem>>, vector<128x128xf32>
    %7 = arith.mulf %1, %3 : vector<16x128xf32>
    %8 = arith.mulf %1, %1 : vector<16x128xf32>
    %9 = tpu.concatenate %1, %3, %7, %8 in 0 : vector<16x128xf32>, vector<16x128xf32>, vector<16x128xf32>, vector<16x128xf32> -> vector<64x128xf32>
    %cst = arith.constant dense<0.000000e+00> : vector<64x128xf32>
    %10 = tpu.matmul %5, %9, %cst {dimension_numbers = #tpu.dot_dimension_numbers<[1], [0], [0], [1], [0, 0, 1, 1], [], []>} : vector<64x64xf32>, vector<64x128xf32>, vector<64x128xf32> -> vector<64x128xf32>
    %cst_11 = arith.constant dense<0.000000e+00> : vector<64x128xf32>
    %11 = tpu.matmul %10, %6, %cst_11 {dimension_numbers = #tpu.dot_dimension_numbers<[1], [0], [0], [1], [0, 0, 1, 1], [], []>} : vector<64x128xf32>, vector<128x128xf32>, vector<64x128xf32> -> vector<64x128xf32>
    %12 = vector.extract_strided_slice %11 {offsets = [0, 0], sizes = [16, 128], strides = [1, 1]} : vector<64x128xf32> to vector<16x128xf32>
    %13 = arith.mulf %12, %4 : vector<16x128xf32>
    %14 = vector.extract_strided_slice %11 {offsets = [16, 0], sizes = [16, 128], strides = [1, 1]} : vector<64x128xf32> to vector<16x128xf32>
    %15 = arith.mulf %14, %4 : vector<16x128xf32>
    %16 = vector.extract_strided_slice %11 {offsets = [32, 0], sizes = [16, 128], strides = [1, 1]} : vector<64x128xf32> to vector<16x128xf32>
    %17 = arith.mulf %16, %4 : vector<16x128xf32>
    %18 = vector.extract_strided_slice %11 {offsets = [48, 0], sizes = [16, 128], strides = [1, 1]} : vector<64x128xf32> to vector<16x128xf32>
    %19 = arith.mulf %18, %4 : vector<16x128xf32>
    %20 = arith.mulf %13, %15 : vector<16x128xf32>
    %21 = arith.subf %17, %20 : vector<16x128xf32>
    %22 = arith.mulf %13, %13 : vector<16x128xf32>
    %23 = arith.subf %19, %22 : vector<16x128xf32>
    %cst_12 = arith.constant 0.00999999977 : f32
    %24 = vector.broadcast %cst_12 : f32 to vector<16x128xf32>
    %25 = arith.addf %23, %24 : vector<16x128xf32>
    %26 = tpu.reciprocal %25 : vector<16x128xf32> -> vector<16x128xf32>
    %27 = arith.mulf %21, %26 : vector<16x128xf32>
    %28 = arith.mulf %27, %13 : vector<16x128xf32>
    %29 = arith.subf %15, %28 : vector<16x128xf32>
    %30 = tpu.concatenate %27, %29 in 0 : vector<16x128xf32>, vector<16x128xf32> -> vector<32x128xf32>
    %c0_13 = arith.constant 0 : index
    %c0_14 = arith.constant 0 : index
    %31 = vector.load %arg4[%c0_13, %c0_14] : memref<64x64xf32, #tpu.memory_space<vmem>>, vector<32x32xf32>
    %cst_15 = arith.constant dense<0.000000e+00> : vector<32x128xf32>
    %32 = tpu.matmul %31, %30, %cst_15 {dimension_numbers = #tpu.dot_dimension_numbers<[1], [0], [0], [1], [0, 0, 1, 1], [], []>} : vector<32x32xf32>, vector<32x128xf32>, vector<32x128xf32> -> vector<32x128xf32>
    %cst_16 = arith.constant dense<0.000000e+00> : vector<32x128xf32>
    %33 = tpu.matmul %32, %6, %cst_16 {dimension_numbers = #tpu.dot_dimension_numbers<[1], [0], [0], [1], [0, 0, 1, 1], [], []>} : vector<32x128xf32>, vector<128x128xf32>, vector<32x128xf32> -> vector<32x128xf32>
    %34 = vector.extract_strided_slice %33 {offsets = [0, 0], sizes = [16, 128], strides = [1, 1]} : vector<32x128xf32> to vector<16x128xf32>
    %35 = arith.mulf %34, %4 : vector<16x128xf32>
    %36 = vector.extract_strided_slice %33 {offsets = [16, 0], sizes = [16, 128], strides = [1, 1]} : vector<32x128xf32> to vector<16x128xf32>
    %37 = arith.mulf %36, %4 : vector<16x128xf32>
    %38 = arith.mulf %35, %1 : vector<16x128xf32>
    %39 = arith.addf %38, %37 : vector<16x128xf32>
    %c0_17 = arith.constant 0 : index
    %c0_18 = arith.constant 0 : index
    %c0_19 = arith.constant 0 : index
    %40 = vector.load %arg6[%c0_17, %c0_18, %c0_19] : memref<1x16x128xf32, #tpu.memory_space<vmem>>, vector<1x16x128xf32>
    %41 = vector.shape_cast %40 : vector<1x16x128xf32> to vector<16x128xf32>
    %42 = vector.shape_cast %39 : vector<16x128xf32> to vector<1x16x128xf32>
    tpu.vector_store %arg6[%c0_17, %c0_18, %c0_19], %42 {strides = array<i32>} : memref<1x16x128xf32, #tpu.memory_space<vmem>>, vector<1x16x128xf32>,
    return
  }
  func.func @transform_0(%arg0: i32) -> (i32, i32, i32) {
    %c0_i32 = arith.constant 0 : i32
    %c0_i32_0 = arith.constant 0 : i32
    %c0_i32_1 = arith.constant 0 : i32
    return %arg0, %c0_i32, %c0_i32_0 : i32, i32, i32
  }
  func.func @transform_1(%arg0: i32) -> (i32, i32, i32) {
    %c0_i32 = arith.constant 0 : i32
    %c0_i32_0 = arith.constant 0 : i32
    %c0_i32_1 = arith.constant 0 : i32
    return %arg0, %c0_i32, %c0_i32_0 : i32, i32, i32
  }
  func.func @transform_2(%arg0: i32) -> (i32, i32) {
    %c0_i32 = arith.constant 0 : i32
    %c0_i32_0 = arith.constant 0 : i32
    %c0_i32_1 = arith.constant 0 : i32
    return %c0_i32, %c0_i32_0 : i32, i32
  }
  func.func @transform_3(%arg0: i32) -> (i32, i32) {
    %c0_i32 = arith.constant 0 : i32
    %c0_i32_0 = arith.constant 0 : i32
    %c0_i32_1 = arith.constant 0 : i32
    return %c0_i32, %c0_i32_0 : i32, i32
  }
  func.func @transform_4(%arg0: i32) -> (i32, i32) {
    %c0_i32 = arith.constant 0 : i32
    %c0_i32_0 = arith.constant 0 : i32
    %c0_i32_1 = arith.constant 0 : i32
    return %c0_i32, %c0_i32_0 : i32, i32
  }
  func.func @transform_5(%arg0: i32) -> (i32, i32, i32) {
    %c0_i32 = arith.constant 0 : i32
    %c0_i32_0 = arith.constant 0 : i32
    %c0_i32_1 = arith.constant 0 : i32
    return %arg0, %c0_i32, %c0_i32_0 : i32, i32, i32
  }
}

</mosaic_0001>

<bundles_post_ra>
// kernel: tpu_custom_call.1
= control target key start
LH: loop header
LB: loop body
LE: loop exit
PB: predicated region body
PF: predicated region fallthrough
CT: control target
= control target key end

     0   :  { %s1858_s0 = inlined_call_operand.hbm [shape: f32[2,16,128], index: 0, kind: input, shape index: {}]   ;;  %s1859_s1 = inlined_call_operand.hbm [shape: f32[2,16,128], index: 1, kind: input, shape index: {}]   ;;  %s1860_s2 = inlined_call_operand.hbm [shape: f32[16,128], index: 2, kind: input, shape index: {}]   ;;  %s1861_s3 = inlined_call_operand.hbm [shape: f32[64,64], index: 3, kind: input, shape index: {}]   ;;  %s1862_s4 = inlined_call_operand.hbm [shape: f32[128,128], index: 4, kind: input, shape index: {}]   ;;  %s1863_s5 = inlined_call_operand.hbm [shape: f32[2,16,128], index: 5, kind: output, shape index: {}]  }
   0x1   :  { %1871 = sst [smem:[#allocation17_spill]] %s1858_s0 }
   0x2   :  { %1872 = sst [smem:[#allocation18_spill]] %s1860_s2 }
   0x3   :  { %1873 = sst [smem:[#allocation19_spill]] %s1861_s3 }
   0x4   :  { %1874 = sst [smem:[#allocation20_spill]] %s1862_s4 }
   0x5   :  { %10 = vsyncpa [#allocation3], 0 }
   0x6   :  { %12 = vsyncpa [#allocation3 + $0x1], 0 }
   0x7   :  { %13 = vsyncpa [#allocation6], 0 }
   0x8   :  { %15 = vsyncpa [#allocation6 + $0x1], 0 }
   0x9   :  { %16 = vsyncpa [#allocation9], 0 }
   0xa   :  { %17 = vsyncpa [#allocation4], 0 }
   0xb   :  { %19 = vsyncpa [#allocation4 + $0x1], 0  ;;  %s1529_s18 = smov 0   ;;  %s1531_s19 = smov 0  }
   0xc   :  { %s1533_s20 = smov 0   ;;  %s1535_s21 = smov 0  }
   0xd LB: > { %s1550_s22 = sadd.s32 4294967295, %s1487_s21   ;;  %s956_s23 = sadd.s32 4294967294, %s1487_s21   ;;  %s1487_s21 = sphi %s1535_s21, %s1898_s21   ;;  %s1483_s20 = sphi %s1533_s20, %s1897_s20   ;;  %s1479_s19 = sphi %s1531_s19, %s1896_s19   ;;  %s1475_s18 = sphi %s1529_s18, %s1895_s18  }
   0xe   : > { %p45_p0 = scmp.ne.s32.totalorder %s1479_s19, %s1475_s18  ;;  %p1864_p1 = scmp.eq.s32.totalorder %s1550_s22, 0 }
   0xf   : > { %p158_p2 = scmp.eq.s32.totalorder %s1550_s22, 1  ;;  %p164_p3 = scmp.eq.s32.totalorder %s956_s23, 1 }
  0x10   : > { %p1559_p4 = por %p1864_p1, %p45_p0  ;;  %p957_p5 = scmp.ge.s32.totalorder %s1487_s21, 1 }
  0x11   : > { %p1564_p6 = por %p164_p3, %p45_p0  ;;  %p171_p7 = scmp.lt.s32.totalorder %s1487_s21, 3 }
  0x12   : > { %s1875_s24 = scalar_select %p1559_p4, 1, 0 }
  0x13   : > { %s1876_s25 = scalar_select %p1564_p6, 1, 0 }
  0x14   : > { %p1569_p8 = pnand %p957_p5, %p171_p7  ;;  %s1489_s27 = smov [#allocation7]  }
  0x15   : > { %s183_s28 = sshll.u32 %s1489_s27, 4  ;;  %s1490_s30 = smov [#allocation8]   ;;  %s184_s28 = int_to_ptr.vmem [resolvable:$true] %s183_s28 }
  0x16   : > { %p1205_p9 = pneg %p1569_p8  ;;  %s196_s6 = sshll.u32 %s1490_s30, 4  ;;  %s197_s6 = int_to_ptr.vmem [resolvable:$true] %s196_s6 }
  0x17   : > { %s1491_s7 = smov [#allocation10]   ;;  %s1288_s9 = scalar_lea.vmem %s184_s28, 256 }
  0x18   : > { %p1578_p11 = pnand %p1205_p9, %p1864_p1  ;;  %s209_s8 = sshll.u32 %s1491_s7, 4  ;;  %s210_s8 = int_to_ptr.vmem [resolvable:$true] %s209_s8 }
  0x19   : > { %p1289_p13 = scmp.ne.s32.totalorder %s184_s28, %s1288_s9  ;;  %p1296_p5 = scmp.lt.s32.totalorder %s184_s28, %s184_s28 }
  0x1a   : > { %p1279_p12 = pneg %p1578_p11  ;;  %p1297_p7 = scmp.lt.s32.totalorder %s1288_s9, %s1288_s9 }
  0x1c   : > { %p1291_p0 = pnand %p1289_p13, %p1279_p12  ;;  %p1298_p9 = por %p1297_p7, %p1296_p5 }
  0x1e   : > { %p1292_p3 = pneg %p1291_p0 }
  0x20   : > { %p1299_p10 = pnand %p1298_p9, %p1292_p3 }
  0x22   : > { %1302 = shalt.err (!%p1299_p10)
}
  0x23   : > { %s1865_s10 = smov 128   ;;  %s1867_s11 = smov 8  }
  0x24   : > { %s1879_s2 = sld [smem:[#allocation18_spill]]  ;;  %s1314_s14 = scalar_lea.vmem %s197_s6, 1024 }
  0x25   : > { %p1315_p13 = scmp.ne.s32.totalorder %s197_s6, %s1314_s14  ;;  %p1322_p3 = scmp.lt.s32.totalorder %s197_s6, %s197_s6 }
  0x26   : > { %p1323_p10 = scmp.lt.s32.totalorder %s1314_s14, %s1314_s14 }
  0x27   : > { %p1317_p0 = pnand %p1315_p13, %p1279_p12 }
  0x28   : > { %p1324_p7 = por %p1323_p10, %p1322_p3 }
  0x29   : > { %p1318_p5 = pneg %p1317_p0 }
  0x2a   : > { %1208 = dma.hbm_to_vmem [thread:$0]  (!%p1578_p11), %s1879_s2, 256, %s184_s28, [#allocation6], %s1865_s10, %s1865_s10, %s1867_s11  }
  0x2b   : > { %p1325_p9 = pnand %p1324_p7, %p1318_p5 }
  0x2d   : > { %1328 = shalt.err (!%p1325_p9)
}
  0x2e   : > { %s1880_s3 = sld [smem:[#allocation19_spill]]  ;;  %s1340_s17 = scalar_lea.vmem %s210_s8, 2048 }
  0x2f   : > { %p1341_p1 = scmp.ne.s32.totalorder %s210_s8, %s1340_s17  ;;  %p1348_p3 = scmp.lt.s32.totalorder %s210_s8, %s210_s8 }
  0x30   : > { %p1349_p5 = scmp.lt.s32.totalorder %s1340_s17, %s1340_s17 }
  0x31   : > { %p1343_p13 = pnand %p1341_p1, %p1279_p12 }
  0x32   : > { %p1350_p10 = por %p1349_p5, %p1348_p3 }
  0x33   : > { %p1344_p0 = pneg %p1343_p13 }
  0x34   : > { %1211 = dma.hbm_to_vmem [thread:$0]  (!%p1578_p11), %s1880_s3, 1024, %s197_s6, [#allocation9], %s1865_s10, %s1865_s10, %s1867_s11  }
  0x35   : > { %p1351_p7 = pnand %p1350_p10, %p1344_p0 }
  0x37   : > { %1354 = shalt.err (!%p1351_p7)
}
  0x38   : > { %s1881_s4 = sld [smem:[#allocation20_spill]]  ;;  %s1618_s28 = sadd.s32 1, %s1487_s21  }
  0x39   : > { %s29_s29 = ssub.s32 %s1487_s21, %s1618_s28  ;;  %s32_s30 = sadd.s32 1, %s1483_s20 }
  0x3a   : > { %p30_p1 = scmp.eq.s32.totalorder %s29_s29, 0  ;;  %p39_p12 = scmp.ne.s32.totalorder %s1483_s20, %s1479_s19 }
  0x3b   : > { %p40_p9 = scmp.eq.s32.totalorder %s1487_s21, 0  ;;  %p1229_p13 = scmp.lt.s32.totalorder %s1487_s21, 2 }
  0x3c   : > { %s1628_s6 = scalar_select %p30_p1, %s1483_s20, %s32_s30  }
  0x3d   : > { %p41_p0 = por %p40_p9, %p39_p12  ;;  %p1632_p3 = por %p158_p2, %p39_p12 }
  0x3e   : > { %1214 = dma.hbm_to_vmem [thread:$0]  (!%p1578_p11), %s1881_s4, 2048, %s210_s8, [#allocation9], %s1865_s10, %s1865_s10, %s1867_s11  }
  0x3f   : > { %s1882_s7 = scalar_select %p1632_p3, 1, 0 }
  0x40   : > { %s223_s9 = sand.u32 1, %s1483_s20   ;;  %s992_s12 = sshll.u32 %s1487_s21, 8 }
  0x41   : > { %s1638_s8 = sshll.u32 %s223_s9, 4  ;;  %s1883_s0 = sld [smem:[#allocation17_spill]] }
  0x42   : > { %s227_s16 = scalar_lea.vmem [#allocation2], %s1638_s8  ;;  %p1646_p11 = pnand %p1229_p13, %p41_p0 }
  0x43   : > { %s234_s17 = sshll.u32 %s227_s16, 4  ;;  %s1655_s30 = scalar_lea.hbm %s1859_s1, %s992_s12  ;;  %s1650_s17 = int_to_ptr.vmem [resolvable:$true] %s234_s17 }
  0x44   : > { %s1657_s13 = scalar_lea.sflag [#allocation3], %s223_s9  ;;  %p1357_p5 = pneg %p1646_p11 }
  0x47   : > { %s1643_s15 = scalar_lea.hbm %s1883_s0, %s992_s12  ;;  %s1360_s11 = scalar_lea.hbm %s1883_s0, 512 }
  0x48   : > { %s1355_s14 = scalar_lea.hbm %s1643_s15, 256  ;;  %p1361_p1 = scmp.lt.s32.totalorder %s1643_s15, %s1883_s0 }
  0x49   : > { %p1356_p2 = scmp.ne.s32.totalorder %s1643_s15, %s1355_s14  ;;  %p1362_p12 = scmp.lt.s32.totalorder %s1360_s11, %s1355_s14 }
  0x4b   : > { %p1358_p10 = pnand %p1357_p5, %p1356_p2  ;;  %p1363_p9 = por %p1362_p12, %p1361_p1 }
  0x4d   : > { %p1359_p7 = pneg %p1358_p10 }
  0x4f   : > { %p1364_p13 = pnand %p1363_p9, %p1359_p7 }
  0x51   : > { %1367 = shalt.err (!%p1364_p13)
}
  0x52   : > { %s1368_s9 = scalar_lea.vmem %s1650_s17, 256  ;;  %s1494_s10 = smov [#allocation2]  }
  0x53   : > { %p1369_p0 = scmp.ne.s32.totalorder %s1650_s17, %s1368_s9  ;;  %s1373_s12 = sshll.u32 %s1494_s10, 4  ;;  %s1374_s12 = int_to_ptr.vmem [resolvable:$false] %s1373_s12 }
  0x54   : > { %s1375_s27 = scalar_lea.vmem %s1374_s12, 512  ;;  %p1376_p6 = scmp.lt.s32.totalorder %s1650_s17, %s1374_s12 }
  0x55   : > { %p1371_p2 = pnand %p1369_p0, %p1357_p5  ;;  %p1377_p3 = scmp.lt.s32.totalorder %s1375_s27, %s1368_s9 }
  0x57   : > { %p1372_p10 = pneg %p1371_p2  ;;  %p1378_p4 = por %p1377_p3, %p1376_p6 }
  0x59   : > { %p1379_p1 = pnand %p1378_p4, %p1372_p10 }
  0x5b   : > { %1382 = shalt.err (!%p1379_p1)
}
  0x5c   : > { %s1885_s2 = smov 8   ;;  %s1886_s3 = smov 128  }
  0x5d   : > { %1218 = dma.hbm_to_vmem [thread:$0]  (!%p1646_p11), %s1643_s15, 256, %s1650_s17, %s1657_s13, %s1886_s3, %s1886_s3, %s1885_s2  }
  0x5e   : > { %s248_s11 = scalar_lea.vmem [#allocation5], %s1638_s8  ;;  %s244_s14 = sand.u32 1, %s1487_s21  }
  0x5f   : > { %s255_s29 = sshll.u32 %s248_s11, 4  ;;  %s245_s16 = scalar_lea.sflag [#allocation6], %s244_s14  ;;  %s1689_s29 = int_to_ptr.vmem [resolvable:$true] %s255_s29 }
  0x60   : > { %s1383_s9 = scalar_lea.hbm %s1655_s30, 256  ;;  %s1388_s27 = scalar_lea.hbm %s1859_s1, 512 }
  0x61   : > { %p1384_p4 = scmp.ne.s32.totalorder %s1655_s30, %s1383_s9  ;;  %p1389_p7 = scmp.lt.s32.totalorder %s1655_s30, %s1859_s1 }
  0x62   : > { %p1390_p12 = scmp.lt.s32.totalorder %s1388_s27, %s1383_s9 }
  0x63   : > { %p1386_p6 = pnand %p1384_p4, %p1357_p5 }
  0x64   : > { %p1391_p9 = por %p1390_p12, %p1389_p7 }
  0x65   : > { %p1387_p3 = pneg %p1386_p6 }
  0x67   : > { %p1392_p13 = pnand %p1391_p9, %p1387_p3 }
  0x69   : > { %1395 = shalt.err (!%p1392_p13)
}
  0x6a   : > { %s1396_s8 = scalar_lea.vmem %s1689_s29, 256  ;;  %s1495_s15 = smov [#allocation5]  }
  0x6b   : > { %p1397_p0 = scmp.ne.s32.totalorder %s1689_s29, %s1396_s8  ;;  %s1401_s17 = sshll.u32 %s1495_s15, 4  ;;  %s1402_s17 = int_to_ptr.vmem [resolvable:$false] %s1401_s17 }
  0x6c   : > { %s1403_s13 = scalar_lea.vmem %s1402_s17, 512  ;;  %p1404_p1 = scmp.lt.s32.totalorder %s1689_s29, %s1402_s17 }
  0x6d   : > { %p1399_p2 = pnand %p1397_p0, %p1357_p5  ;;  %p1405_p4 = scmp.lt.s32.totalorder %s1403_s13, %s1396_s8 }
  0x6f   : > { %p1400_p10 = pneg %p1399_p2  ;;  %p1406_p6 = por %p1405_p4, %p1404_p1 }
  0x71   : > { %p1407_p7 = pnand %p1406_p6, %p1400_p10 }
  0x73   : > { %1410 = shalt.err (!%p1407_p7)
}
  0x74   : > { %1221 = dma.hbm_to_vmem [thread:$0]  (!%p1646_p11), %s1655_s30, 256, %s1689_s29, %s245_s16, %s1886_s3, %s1886_s3, %s1885_s2  }
  0x75   : > { %267 = sbr.rel (%p1569_p8) target bundleno = 999 (0x3e7), region = 40  ;;  %s1719_s0 = sand.u32 (!%p1569_p8), 1, %s1479_s19  }
  0x76   : > { %s1722_s4 = sshll.u32 (!%p1569_p8), %s1719_s0, 4  ;;  %s270_s11 = scalar_lea.sflag (!%p1569_p8), [#allocation3], %s1719_s0 }
  0x77   : > { %s273_s23 = scalar_lea.vmem (!%p1569_p8), [#allocation2], %s1722_s4  ;;  %p1887_p5 = scmp.ne.s32.totalorder (!%p1569_p8), %s1875_s24, 0 }
  0x7a   : > { %1454 = dma.done.wait (%p1887_p5), %s270_s11, 256  }
  0x7b   : > { %1456 = vsyncadd (%p1887_p5), %s270_s11, 4294967040  ;;  %s278_s26 = sand.u32 1, %s1550_s22   ;;  %s282_s2 = scalar_lea.vmem [#allocation5], %s1722_s4 }
  0x7c   : > { %s279_s30 = scalar_lea.sflag [#allocation6], %s278_s26 }
  0x7d   : > { %1458 = dma.done.wait (%p1887_p5), %s279_s30, 256  }
  0x7e   : > { %1460 = vsyncadd (%p1887_p5), %s279_s30, 4294967040  ;;  %p1888_p8 = scmp.eq.s32.totalorder %s1550_s22, 0 }
  0x80   : > { %1462 = dma.done.wait (%p1888_p8), [#allocation6], 256   ;;  %p1889_p11 = pmov %p1888_p8 }
  0x81   : > { %p1890_p3 = pmov %p1888_p8 }
  0x82   : > { %1464 = vsyncadd (%p1889_p11), [#allocation6], 4294967040 }
  0x83   : > { %1466 = dma.done.wait (%p1890_p3), [#allocation9], 3072   ;;  %p1891_p12 = pmov %p1890_p3 }
  0x84   : > { %vm360_vm0 = vcmask 523264   ;;  %v1744_v0 = vld [vmem:[%s273_s23 + $0x8] sm:$0xff]  ;;  %v1746_v1 = vld [vmem:[%s273_s23] sm:$0xff]  ;;  %vm625_vm1 = vcmask 261120   ;;  %s325_s24 = scalar_lea.vmem [#allocation11], %s1722_s4  ;;  %s994_s29 = sshll.u32 %s1550_s22, 8 }
  0x85   : > { %1468 = vsyncadd (%p1891_p12), [#allocation9], 4294964224  ;;  %v329_v2 = vld [vmem:[%s282_s2 + $0x8] sm:$0xff]  ;;  %v359_v3 = vmul.f32 %v1744_v0, %v1744_v0  ;;  %v358_v4 = vmul.f32 %v1746_v1, %v1746_v1  ;;  %v1752_v5 = vld [vmem:[#allocation8] sm:$0xff]  ;;  %s832_s3 = sshll.u32 %s325_s24, 4  ;;  %s1815_s9 = scalar_lea.hbm %s1863_s5, %s994_s29  ;;  %s1809_s3 = int_to_ptr.vmem [resolvable:$true] %s832_s3 }
  0x86   : > { %v328_v6 = vld [vmem:[%s282_s2] sm:$0xff]  ;;  %1079 = vmatprep.mubr.msk.f32.mxu0 %vm360_vm0, %v1752_v5  ;;  %v357_v7 = vmul.f32 %v329_v2, %v1744_v0  ;;  %v355_v8 = vld [vmem:[#allocation10 + $0x78] sm:$0xff]  ;;  %v1758_v11 = vld [vmem:[#allocation10 + $0x68] sm:$0xff]  ;;  %s819_s22 = scalar_lea.sflag [#allocation4], %s1719_s0  ;;  %s1411_s10 = scalar_lea.vmem %s1809_s3, 256 }
  0x87   : > { %1063 = vmatprep.subr.mxu0 %v359_v3  ;;  %v354_v9 = vld [vmem:[#allocation10 + $0x70] sm:$0xff]  ;;  %v356_v10 = vmul.f32 %v328_v6, %v1746_v1  ;;  %1091 = vmatprep.subr.mxu1 %v355_v8  ;;  %v1760_v12 = vld [vmem:[#allocation10 + $0x60] sm:$0xff]  ;;  %v351_v13 = vld [vmem:[#allocation10 + $0x58] sm:$0xff]  ;;  %p1412_p9 = scmp.ne.s32.totalorder %s1809_s3, %s1411_s10  ;;  %p1892_p13 = scmp.ne.s32.totalorder %s1882_s7, 0 }
  0x88   : > { %1064 = vmatpush3.msra.mxu0 %v359_v3  ;;  %1092 = vmatpush3.msra.mxu1 %v355_v8  ;;  %v350_v14 = vld [vmem:[#allocation10 + $0x50] sm:$0xff]  ;;  %v349_v15 = vld [vmem:[#allocation10 + $0x48] sm:$0xff]  ;;  %v348_v17 = vld [vmem:[#allocation10 + $0x40] sm:$0xff]  ;;  %s1496_s12 = smov [#allocation11]  }
  0x89   : > { %1065 = vmatprep.subr.mxu0 %v358_v4  ;;  %1093 = vmatprep.subr.mxu1 %v354_v9  ;;  %v1768_v16 = vld [vmem:[#allocation8 + $0x8] sm:$0xff]  ;;  %v1771_v18 = vld [vmem:[#allocation8 + $0x10] sm:$0xff]  ;;  %v347_v19 = vld [vmem:[#allocation10 + $0x38] sm:$0xff]  ;;  %p1413_p0 = pnand %p1412_p9, %p1892_p13  ;;  %s1415_s27 = sshll.u32 %s1496_s12, 4  ;;  %s1416_s27 = int_to_ptr.vmem [resolvable:$false] %s1415_s27 }
  0x8a   : > { %1066 = vmatpush3.msra.mxu0 %v358_v4  ;;  %1094 = vmatpush3.msra.mxu1 %v354_v9  ;;  %v1778_v20 = vld [vmem:[#allocation8 + $0x18] sm:$0xff]  ;;  %v346_v21 = vld [vmem:[#allocation10 + $0x30] sm:$0xff]  ;;  %v336_v22 = vld [vmem:[#allocation8 + $0x20] sm:$0xff]  ;;  %s1417_s8 = scalar_lea.vmem %s1416_s27, 512  ;;  %p1418_p10 = scmp.lt.s32.totalorder %s1809_s3, %s1416_s27 }
  0x8b   : > { %1067 = vmatprep.subr.mxu0 %v357_v7  ;;  %1095 = vmatprep.subr.mxu1 %v1758_v11  ;;  %v345_v23 = vld [vmem:[#allocation10 + $0x28] sm:$0xff]  ;;  %v344_v25 = vld [vmem:[#allocation10 + $0x20] sm:$0xff]  ;;  %v338_v26 = vld [vmem:[#allocation8 + $0x30] sm:$0xff]  ;;  %p1414_p2 = pneg %p1413_p0  ;;  %p1419_p1 = scmp.lt.s32.totalorder %s1417_s8, %s1411_s10 }
  0x8c   : > { %1068 = vmatpush3.msra.mxu0 %v357_v7  ;;  %1096 = vmatpush3.msra.mxu1 %v1758_v11  ;;  %v337_v24 = vld [vmem:[#allocation8 + $0x28] sm:$0xff]  ;;  %v343_v27 = vld [vmem:[#allocation10 + $0x18] sm:$0xff]  ;;  %v342_v29 = vld [vmem:[#allocation10 + $0x10] sm:$0xff] }
  0x8d   : > { %1069 = vmatprep.subr.mxu0 %v356_v10  ;;  %1097 = vmatprep.subr.mxu1 %v1760_v12  ;;  %v339_v28 = vld [vmem:[#allocation8 + $0x38] sm:$0xff]  ;;  %v341_v30 = vld [vmem:[#allocation10 + $0x8] sm:$0xff]  ;;  %v340_v31 = vld [vmem:[#allocation10] sm:$0xff]  ;;  %p1420_p4 = por %p1419_p1, %p1418_p10 }
  0x8e   : > { %1070 = vmatpush3.msra.mxu0 %v356_v10  ;;  %1098 = vmatpush3.msra.mxu1 %v1760_v12  ;;  %v331_v43 = vld [vmem:[#allocation7 + $0x8] sm:$0xff]  ;;  %v1792_v45 = vld [vmem:[#allocation7] sm:$0xff] }
  0x8f   : > { %1071 = vmatprep.subr.mxu0 %v329_v2  ;;  %1099 = vmatprep.subr.mxu1 %v351_v13  ;;  %p1421_p6 = pnand %p1420_p4, %p1414_p2 }
  0x90   : > { %1072 = vmatpush3.msra.mxu0 %v329_v2  ;;  %1100 = vmatpush3.msra.mxu1 %v351_v13 }
  0x91   : > { %1073 = vmatprep.subr.mxu0 %v328_v6  ;;  %1101 = vmatprep.subr.mxu1 %v350_v14 }
  0x92   : > { %1074 = vmatpush3.msra.mxu0 %v328_v6  ;;  %1102 = vmatpush3.msra.mxu1 %v350_v14 }
  0x93   : > { %1075 = vmatprep.subr.mxu0 %v1744_v0  ;;  %1103 = vmatprep.subr.mxu1 %v349_v15 }
  0x94   : > { %1076 = vmatpush3.msra.mxu0 %v1744_v0  ;;  %1104 = vmatpush3.msra.mxu1 %v349_v15 }
  0x95   : > { %1077 = vmatprep.subr.mxu0 %v1746_v1  ;;  %1105 = vmatprep.subr.mxu1 %v348_v17 }
  0x96   : > { %1078 = vmatpush3.msra.mxu0 %v1746_v1  ;;  %1106 = vmatpush3.msra.mxu1 %v348_v17 }
  0x97   : > { %1080 = vmatmul.mubr.msk.f32.vlgmr.msra.gmra.mxu0 %vm360_vm0, %v1768_v16  ;;  %1107 = vmatprep.subr.mxu1 %v347_v19 }
  0x98   : > { %1082 = vmatprep.mubr.msk.f32.mxu0 %vm360_vm0, %v1771_v18  ;;  %1149 = vmatprep.subr.mxu0 %v355_v8 }
  0x99   : > { %1108 = vmatpush3.msra.mxu1 %v347_v19  ;;  %1150 = vmatpush3.msra.mxu0 %v355_v8 }
  0x9a   : > { %1109 = vmatprep.subr.mxu1 %v346_v21  ;;  %1151 = vmatprep.subr.mxu0 %v354_v9 }
  0x9b   : > { %1083 = vmatmul.mubr.msk.f32.gmra.mxu0 %vm360_vm0, %v1778_v20  ;;  %1110 = vmatpush3.msra.mxu1 %v346_v21 }
  0x9c   : > { %1085 = vmatprep.mubr.msk.f32.mxu0 %vm360_vm0, %v336_v22  ;;  %1111 = vmatprep.subr.mxu1 %v345_v23 }
  0x9d   : > { %1112 = vmatpush3.msra.mxu1 %v345_v23  ;;  %1152 = vmatpush3.msra.mxu0 %v354_v9 }
  0x9e   : > { %1113 = vmatprep.subr.mxu1 %v344_v25  ;;  %1153 = vmatprep.subr.mxu0 %v1758_v11 }
  0x9f   : > { %1086 = vmatmul.mubr.msk.f32.gmra.mxu0 %vm360_vm0, %v337_v24  ;;  %1114 = vmatpush3.msra.mxu1 %v344_v25 }
  0xa0   : > { %1088 = vmatprep.mubr.msk.f32.mxu0 %vm360_vm0, %v338_v26  ;;  %1115 = vmatprep.subr.mxu1 %v343_v27 }
  0xa1   : > { %1116 = vmatpush3.msra.mxu1 %v343_v27  ;;  %1154 = vmatpush3.msra.mxu0 %v1758_v11 }
  0xa2   : > { %1117 = vmatprep.subr.mxu1 %v342_v29  ;;  %1155 = vmatprep.subr.mxu0 %v1760_v12 }
  0xa3   : > { %1089 = vmatmul.mubr.msk.f32.gmra.mxu0 %vm360_vm0, %v339_v28  ;;  %1118 = vmatpush3.msra.mxu1 %v342_v29 }
  0xa4   : > { %1156 = vmatpush3.msra.mxu0 %v1760_v12  ;;  %1119 = vmatprep.subr.mxu1 %v341_v30 }
  0xa5   : > { %1157 = vmatprep.subr.mxu0 %v351_v13  ;;  %1120 = vmatpush3.msra.mxu1 %v341_v30 }
  0xa6   : > { %1158 = vmatpush3.msra.mxu0 %v351_v13  ;;  %1121 = vmatprep.subr.mxu1 %v340_v31 }
  0xa7   : > { %1159 = vmatprep.subr.mxu0 %v350_v14  ;;  %1122 = vmatpush3.msra.mxu1 %v340_v31 }
  0xa8   : > { %1160 = vmatpush3.msra.mxu0 %v350_v14 }
  0xa9   : > { %1161 = vmatprep.subr.mxu0 %v349_v15 }
  0xaa   : > { %1162 = vmatpush3.msra.mxu0 %v349_v15 }
  0xab   : > { %1163 = vmatprep.subr.mxu0 %v348_v17 }
  0xac   : > { %1164 = vmatpush3.msra.mxu0 %v348_v17 }
  0xad   : > { %1165 = vmatprep.subr.mxu0 %v347_v19 }
  0xae   : > { %1166 = vmatpush3.msra.mxu0 %v347_v19 }
  0xaf   : > { %1167 = vmatprep.subr.mxu0 %v346_v21 }
  0xb0   : > { %1168 = vmatpush3.msra.mxu0 %v346_v21 }
  0xb1   : > { %1169 = vmatprep.subr.mxu0 %v345_v23 }
  0xb2   : > { %1170 = vmatpush3.msra.mxu0 %v345_v23 }
  0xb3   : > { %1171 = vmatprep.subr.mxu0 %v344_v25 }
  0xb4   : > { %1172 = vmatpush3.msra.mxu0 %v344_v25 }
  0xb5   : > { %1173 = vmatprep.subr.mxu0 %v343_v27 }
  0xb6   : > { %1174 = vmatpush3.msra.mxu0 %v343_v27 }
  0xb7   : > { %1175 = vmatprep.subr.mxu0 %v342_v29 }
  0xb8   : > { %1176 = vmatpush3.msra.mxu0 %v342_v29 }
  0xb9   : > { %1177 = vmatprep.subr.mxu0 %v341_v30 }
  0xba   : > { %1178 = vmatpush3.msra.mxu0 %v341_v30 }
  0xbb   : > { %1179 = vmatprep.subr.mxu0 %v340_v31 }
  0xbc   : > { %1180 = vmatpush3.msra.mxu0 %v340_v31 }
 0x157   : > { %v1081_v32 = vpop.f32.mrf.mxu0 }
 0x159   : > { %v451_v33 = vpop.f32.mrf.mxu0 }
 0x15a   : > { %1123 = vmatprep.mubr.f32.mxu1 %v451_v33 }
 0x15b   : > { %v1084_v34 = vpop.f32.mrf.mxu0  ;;  %1124 = vmatmul.mubr.f32.vlgmr.msra.gmra.mxu1 %v1081_v32 }
 0x15d   : > { %v461_v35 = vpop.f32.mrf.mxu0 }
 0x15e   : > { %1126 = vmatprep.mubr.f32.mxu1 %v461_v35 }
 0x15f   : > { %v1087_v36 = vpop.f32.mrf.mxu0  ;;  %1127 = vmatmul.mubr.f32.gmra.mxu1 %v1084_v34 }
 0x161   : > { %v471_v37 = vpop.f32.mrf.mxu0 }
 0x162   : > { %1129 = vmatprep.mubr.f32.mxu1 %v471_v37 }
 0x163   : > { %v1090_v38 = vpop.f32.mrf.mxu0  ;;  %1130 = vmatmul.mubr.f32.gmra.mxu1 %v1087_v36 }
 0x165   : > { %v481_v39 = vpop.f32.mrf.mxu0 }
 0x166   : > { %1132 = vmatprep.mubr.f32.mxu1 %v481_v39 }
 0x167   : > { %1133 = vmatmul.mubr.f32.gmra.mxu1 %v1090_v38 }
 0x168   : > { %1143 = vmatprep.mubr.msk.f32.mxu1 %vm625_vm1, %v1752_v5 }
 0x21b   : > { %v1125_v40 = vpop.f32.mrf.mxu1 }
 0x21c   : > { %v596_v47 = vmul.f32 %v1125_v40, %v331_v43 }
 0x21d   : > { %v556_v41 = vpop.f32.mrf.mxu1 }
 0x21e   : > { %v595_v49 = vmul.f32 %v556_v41, %v1792_v45  ;;  %v608_v52 = vmul.f32 %v596_v47, %v596_v47 }
 0x21f   : > { %v1128_v42 = vpop.f32.mrf.mxu1 }
 0x220   : > { %v607_v56 = vmul.f32 %v595_v49, %v595_v49  ;;  %v598_v60 = vmul.f32 %v1128_v42, %v331_v43 }
 0x221   : > { %v566_v44 = vpop.f32.mrf.mxu1 }
 0x222   : > { %v597_v61 = vmul.f32 %v566_v44, %v1792_v45  ;;  %v604_v63 = vmul.f32 %v598_v60, %v596_v47 }
 0x223   : > { %v1131_v46 = vpop.f32.mrf.mxu1 }
 0x224   : > { %v600_v62 = vmul.f32 %v1131_v46, %v331_v43  ;;  %v603_v3 = vmul.f32 %v597_v61, %v595_v49 }
 0x225   : > { %v576_v48 = vpop.f32.mrf.mxu1 }
 0x226   : > { %v599_v2 = vmul.f32 %v576_v48, %v1792_v45  ;;  %v606_v4 = vsub.f32 %v600_v62, %v604_v63 }
 0x227   : > { %v1134_v50 = vpop.f32.mrf.mxu1 }
 0x228   : > { %v602_v51 = vmul.f32 %v1134_v50, %v331_v43  ;;  %v605_v6 = vsub.f32 %v599_v2, %v603_v3 }
 0x229   : > { %v586_v53 = vpop.f32.mrf.mxu1 }
 0x22a   : > { %v610_v54 = vsub.f32 %v602_v51, %v608_v52  ;;  %v601_v55 = vmul.f32 %v586_v53, %v1792_v45 }
 0x22c   : > { %v612_v57 = vadd.f32 0.01, %v610_v54  ;;  %v609_v58 = vsub.f32 %v601_v55, %v607_v56 }
 0x22e   : > { %1273 = vrcp.f32 %v612_v57  ;;  %v611_v59 = vadd.f32 0.01, %v609_v58 }
 0x230   : > { %1275 = vrcp.f32 %v611_v59 }
 0x23b   : > { %v1274_v5 = vpop.eup %1273 }
 0x23c   : > { %v616_v7 = vmul.f32 %v1274_v5, %v606_v4 }
 0x23d   : > { %v1276_v8 = vpop.eup %1275 }
 0x23e   : > { %v618_v9 = vmul.f32 %v616_v7, %v596_v47  ;;  %v615_v10 = vmul.f32 %v1276_v8, %v605_v6 }
 0x240   : > { %v620_v11 = vsub.f32 %v598_v60, %v618_v9  ;;  %v617_v12 = vmul.f32 %v615_v10, %v595_v49 }
 0x242   : > { %1135 = vmatprep.subr.mxu1 %v620_v11  ;;  %v619_v13 = vsub.f32 %v597_v61, %v617_v12 }
 0x243   : > { %1136 = vmatpush3.msra.mxu1 %v620_v11 }
 0x244   : > { %1137 = vmatprep.subr.mxu1 %v619_v13 }
 0x245   : > { %1138 = vmatpush3.msra.mxu1 %v619_v13 }
 0x246   : > { %1139 = vmatprep.subr.mxu1 %v616_v7 }
 0x247   : > { %1140 = vmatpush3.msra.mxu1 %v616_v7 }
 0x248   : > { %1141 = vmatprep.subr.mxu1 %v615_v10 }
 0x249   : > { %1142 = vmatpush3.msra.mxu1 %v615_v10 }
 0x24a   : > { %1144 = vmatmul.mubr.msk.f32.vlgmr.msra.gmra.mxu1 %vm625_vm1, %v1768_v16 }
 0x24b   : > { %1146 = vmatprep.mubr.msk.f32.mxu1 %vm625_vm1, %v1771_v18 }
 0x24e   : > { %1147 = vmatmul.mubr.msk.f32.gmra.mxu1 %vm625_vm1, %v1778_v20 }
 0x30a   : > { %v1145_v14 = vpop.f32.mrf.mxu1 }
 0x30c   : > { %v704_v15 = vpop.f32.mrf.mxu1 }
 0x30d   : > { %1181 = vmatprep.mubr.f32.mxu0 %v704_v15 }
 0x30e   : > { %v1148_v17 = vpop.f32.mrf.mxu1  ;;  %1182 = vmatmul.mubr.f32.vlgmr.msra.gmra.mxu0 %v1145_v14 }
 0x310   : > { %v714_v19 = vpop.f32.mrf.mxu1 }
 0x311   : > { %1184 = vmatprep.mubr.f32.mxu0 %v714_v19 }
 0x312   : > { %1185 = vmatmul.mubr.f32.gmra.mxu0 %v1148_v17 }
 0x3ce   : > { %v1183_v21 = vpop.f32.mrf.mxu0 }
 0x3cf   : > { %v809_v22 = vmul.f32 %v1183_v21, %v331_v43 }
 0x3d0   : > { %v789_v23 = vpop.f32.mrf.mxu0 }
 0x3d1   : > { %v808_v16 = vmul.f32 %v789_v23, %v1792_v45  ;;  %v813_v18 = vmul.f32 %v809_v22, %v1744_v0 }
 0x3d2   : > { %v1186_v24 = vpop.f32.mrf.mxu0 }
 0x3d3   : > { %v811_v20 = vmul.f32 %v1186_v24, %v331_v43  ;;  %v812_v26 = vmul.f32 %v808_v16, %v1746_v1 }
 0x3d4   : > { %v799_v25 = vpop.f32.mrf.mxu0 }
 0x3d5   : > { %v815_v27 = vadd.f32 %v813_v18, %v811_v20  ;;  %v810_v28 = vmul.f32 %v799_v25, %v1792_v45 }
 0x3d7   : > { %817 = vst [vmem:[%s325_s24 + $0x8] sm:$0xff] %v815_v27  ;;  %v814_v0 = vadd.f32 %v812_v26, %v810_v28 }
 0x3d9   : > { %816 = vst [vmem:[%s325_s24] sm:$0xff] %v814_v0 }
 0x3da   : > { %1424 = shalt.err (!%p1421_p6)
}
 0x3db   : > { %s1425_s15 = scalar_lea.hbm %s1815_s9, 256  ;;  %s1429_s4 = scalar_lea.hbm %s1863_s5, 512 }
 0x3dc   : > { %p1426_p7 = scmp.ne.s32.totalorder %s1815_s9, %s1425_s15  ;;  %p1430_p11 = scmp.lt.s32.totalorder %s1815_s9, %s1863_s5 }
 0x3dd   : > { %p1431_p3 = scmp.lt.s32.totalorder %s1429_s4, %s1425_s15 }
 0x3de   : > { %p1427_p5 = pnand %p1426_p7, %p1892_p13 }
 0x3df   : > { %p1432_p12 = por %p1431_p3, %p1430_p11 }
 0x3e0   : > { %p1428_p8 = pneg %p1427_p5 }
 0x3e2   : > { %p1433_p9 = pnand %p1432_p12, %p1428_p8 }
 0x3e4   : > { %1436 = shalt.err (!%p1433_p9)
}
 0x3e5   : > { %s1497_s26 = smov 128   ;;  %s1498_s30 = smov 8  }
 0x3e6   : > { %1203 = dma.vmem_to_hbm [thread:$0]  (%p1892_p13), %s1809_s3, 256, %s1815_s9, %s819_s22, %s1497_s26, %s1497_s26, %s1498_s30  }
 0x3e7 PF: > { %s847_s2 = sand.u32 1, %s1475_s18   ;;  %p1893_p0 = scmp.ne.s32.totalorder %s1876_s25, 0 }
 0x3e8   : > { %p1894_p2 = scmp.ge.s32.totalorder %s1487_s21, 2  ;;  %s848_s24 = scalar_lea.sflag [#allocation4], %s847_s2 }
 0x3ea   : > { %p1223_p10 = pnand %p1894_p2, %p1893_p0 }
 0x3ec   : > { %p1224_p1 = pneg %p1223_p10 }
 0x3ee   : > { %1470 = dma.done.wait (%p1224_p1), %s848_s24, 256  }
 0x3ef   : > { %1472 = vsyncadd (%p1224_p1), %s848_s24, 4294967040  ;;  %p22_p4 = scmp.ge.s32.totalorder %s1618_s28, 4   ;;  %s1895_s18 = smov %s1479_s19 }
 0x3f0   : > { %s1896_s19 = smov %s1483_s20  ;;  %s1897_s20 = smov %s1628_s6 }
 0x3f1   : > { %s1898_s21 = smov %s1618_s28  ;;  %24 = sbr.rel (!%p22_p4) target bundleno = 13 (0xd), region = 110 }
 0x3f6   :  { %853 = vsyncpa [#allocation3], 1 }
 0x3f7   :  { %855 = vsyncpa [#allocation3 + $0x1], 1 }
 0x3f8   :  { %856 = vsyncpa [#allocation6], 1 }
 0x3f9   :  { %858 = vsyncpa [#allocation6 + $0x1], 1 }
 0x3fa   :  { %859 = vsyncpa [#allocation9], 1 }
 0x3fb   :  { %860 = vsyncpa [#allocation4], 1 }
 0x3fc   :  { %862 = vsyncpa [#allocation4 + $0x1], 1 }

</bundles_post_ra>
